<compile_context>
chip_gen: v7x
topology: tpu7x:2x2x1
jax: 0.10.0
libtpu: 0.0.40
codegen_flags: <defaults>
</compile_context>

<pallas_src>
import jax
import jax.numpy as jnp
from jax.experimental import pallas as pl
from jax.experimental.pallas import tpu as pltpu


def _round_up(x: int, m: int) -> int:
    return (x + m - 1) // m * m


# ----------------------------------------------------------------------------
# Generic fused encoder kernel: embedding-gather + concat + Linear
# ----------------------------------------------------------------------------
def encoder_kernel(ids_ref,            # scalar-prefetch: (B_pad,) int32 in SMEM
                   f1_ref, f2_ref,     # (TILE_B, d2), (TILE_B, d3) VMEM tiles
                   w_ref, b_ref,       # (dtot, O_pad), (1, O_pad) resident in VMEM
                   emb_hbm,            # (num_user, d_user) stays in HBM (pl.ANY)
                   out_ref,            # (TILE_B, O_pad) lane-dense output tile
                   u_buf, sem):        # scratch: VMEM (TILE_B, d_user), DMA sems (TILE_B,)
    i = pl.program_id(0)
    tile_b, _ = u_buf.shape
    num_user = emb_hbm.shape[0]

    # ---- Embedding gather: one row-DMA per batch element (ids from SMEM). ----
    @pl.loop(0, tile_b)
    def _start(r):
        idx = ids_ref[i * tile_b + r]
        # Clamp like a JAX gather (also keeps padded rows in-bounds).
        idx = jnp.minimum(jnp.maximum(idx, 0), num_user - 1)
        pltpu.make_async_copy(
            emb_hbm.at[pl.ds(idx, 1), :],
            u_buf.at[pl.ds(r, 1), :],
            sem.at[r],
        ).start()

    @pl.loop(0, tile_b)
    def _wait(r):
        pltpu.make_async_copy(
            emb_hbm.at[pl.ds(0, 1), :],
            u_buf.at[pl.ds(r, 1), :],
            sem.at[r],
        ).wait()

    # ---- Fused "concat + Linear": a single K = d_user+d2+d3 MXU matmul. ----
    cat = jnp.concatenate([u_buf[...], f1_ref[...], f2_ref[...]], axis=-1)
    acc = jnp.dot(cat, w_ref[...], preferred_element_type=jnp.float32)
    out_ref[...] = (acc + b_ref[...]).astype(out_ref.dtype)


# ----------------------------------------------------------------------------
# Parameter preparation (done ONCE, not per forward)
# ----------------------------------------------------------------------------
def prepare_linear(w, b, *, lane=128):
    """w: torch Linear layout (dim_last, dtot); b: (dim_last,).
    Returns (W^T zero-padded to 128 output lanes, bias (1, O_pad), dim_last)."""
    dim_last, _ = w.shape
    o_pad = _round_up(dim_last, lane)
    w_t_pad = jnp.pad(w.T, ((0, 0), (0, o_pad - dim_last)))
    b_pad = jnp.pad(b, (0, o_pad - dim_last)).reshape(1, o_pad)
    return w_t_pad, b_pad, dim_last


# ----------------------------------------------------------------------------
# Encoder forward (used for both QuestionEncoder and AnswerEncoder)
# ----------------------------------------------------------------------------
def encoder_forward(user_id, feat1, feat2, emb_table, w_t_pad, b_pad, dim_last,
                    *, tile_b=128):
    """user_id: (B, 1) int; feat1: (B, 1, d2); feat2: (B, 1, d3)."""
    B = user_id.shape[0]
    d1 = emb_table.shape[1]
    d2 = feat1.shape[-1]
    d3 = feat2.shape[-1]
    dtot, o_pad = w_t_pad.shape
    assert dtot == d1 + d2 + d3

    tile_b = max(8, min(tile_b, _round_up(B, 8)))
    b_rows = _round_up(B, tile_b)

    ids = user_id.reshape(B).astype(jnp.int32)
    f1 = feat1.reshape(B, d2)          # torch.squeeze(dim=1)
    f2 = feat2.reshape(B, d3)
    if b_rows != B:
        pad = b_rows - B
        ids = jnp.pad(ids, (0, pad))
        f1 = jnp.pad(f1, ((0, pad), (0, 0)))
        f2 = jnp.pad(f2, ((0, pad), (0, 0)))

    grid = (b_rows // tile_b,)

    out = pl.pallas_call(
        encoder_kernel,
        out_shape=jax.ShapeDtypeStruct((b_rows, o_pad), f1.dtype),
        grid_spec=pltpu.PrefetchScalarGridSpec(
            num_scalar_prefetch=1,
            grid=grid,
            in_specs=[
                pl.BlockSpec((tile_b, d2), lambda i, ids: (i, 0)),
                pl.BlockSpec((tile_b, d3), lambda i, ids: (i, 0)),
                pl.BlockSpec((dtot, o_pad), lambda i, ids: (0, 0)),   # weight resident
                pl.BlockSpec((1, o_pad), lambda i, ids: (0, 0)),      # bias resident
                pl.BlockSpec(memory_space=pl.ANY),                    # emb table in HBM
            ],
            out_specs=pl.BlockSpec((tile_b, o_pad), lambda i, ids: (i, 0)),
            scratch_shapes=[
                pltpu.VMEM((tile_b, d1), emb_table.dtype),
                pltpu.SemaphoreType.DMA((tile_b,)),
            ],
        ),
        compiler_params=pltpu.CompilerParams(
            dimension_semantics=("parallel",),
            vmem_limit_bytes=48 * 1024 * 1024,
        ),
    )(ids, f1, f2, w_t_pad, b_pad, emb_table)

    return out[:B, :dim_last]


# ----------------------------------------------------------------------------
# VariableModel forward: (q_vec, a_vec)
# ----------------------------------------------------------------------------
def variable_model_forward(question_input, answer_input, params, *, tile_b=128):
    emb = params["user_emb"]
    q_w, q_b, q_dim = params["q_linear"]
    a_w, a_b, a_dim = params["a_linear"]

    # QuestionEncoder: hiddens order = [user_id (global), q_length, word2vec]
    q_vec = encoder_forward(question_input["user_id"],
                            question_input["q_length"],
                            question_input["word2vec"],
                            emb, q_w, q_b, q_dim, tile_b=tile_b)
    # AnswerEncoder: hiddens order = [user_id (global), hist_features, avg_hist_q_embs]
    a_vec = encoder_forward(answer_input["user_id"],
                            answer_input["hist_features"],
                            answer_input["avg_hist_q_embs"],
                            emb, a_w, a_b, a_dim, tile_b=tile_b)
    return q_vec, a_vec


# ----------------------------------------------------------------------------
# Pure-JAX reference
# ----------------------------------------------------------------------------
def reference_encoder(user_id, feat1, feat2, emb_table, w, b):
    u = jnp.squeeze(jnp.take(emb_table, user_id, axis=0), axis=1)
    f1 = jnp.squeeze(feat1, axis=1)
    f2 = jnp.squeeze(feat2, axis=1)
    return jnp.concatenate([u, f1, f2], axis=-1) @ w.T + b


if __name__ == "__main__":
    # Small shapes consistent with the module.
    B = 16
    num_user = 64
    d_user = 32                 # shared user_id embedding dim_out
    d_qlen, d_w2v = 16, 64      # QuestionEncoder identity features
    d_hist, d_avg = 32, 32      # AnswerEncoder identity features
    dim_last = 48               # last_features (int) -> nn.Linear in each encoder

    key = jax.random.PRNGKey(0)
    ks = jax.random.split(key, 12)

    q_user = jax.random.randint(ks[0], (B, 1), 0, num_user, dtype=jnp.int32)
    a_user = jax.random.randint(ks[1], (B, 1), 0, num_user, dtype=jnp.int32)
    q_len = jax.random.normal(ks[2], (B, 1, d_qlen), dtype=jnp.float32)
    q_w2v = jax.random.normal(ks[3], (B, 1, d_w2v), dtype=jnp.float32)
    a_hist = jax.random.normal(ks[4], (B, 1, d_hist), dtype=jnp.float32)
    a_avg = jax.random.normal(ks[5], (B, 1, d_avg), dtype=jnp.float32)

    # Deterministic synthetic parameters.
    emb_table = jax.random.normal(ks[6], (num_user, d_user), dtype=jnp.float32)
    q_w = jax.random.normal(ks[7], (dim_last, d_user + d_qlen + d_w2v),
                            dtype=jnp.float32) * 0.05
    q_b = jax.random.normal(ks[8], (dim_last,), dtype=jnp.float32) * 0.05
    a_w = jax.random.normal(ks[9], (dim_last, d_user + d_hist + d_avg),
                            dtype=jnp.float32) * 0.05
    a_b = jax.random.normal(ks[10], (dim_last,), dtype=jnp.float32) * 0.05

    params = {
        "user_emb": emb_table,
        "q_linear": prepare_linear(q_w, q_b),   # transpose + lane-pad ONCE
        "a_linear": prepare_linear(a_w, a_b),
    }

    question_input = {"user_id": q_user, "q_length": q_len, "word2vec": q_w2v}
    answer_input = {"user_id": a_user, "hist_features": a_hist,
                    "avg_hist_q_embs": a_avg}

    q_vec, a_vec = variable_model_forward(question_input, answer_input, params,
                                          tile_b=8)   # grid of 2 batch tiles
    q_vec, a_vec = jax.block_until_ready((q_vec, a_vec))

    q_ref = reference_encoder(q_user, q_len, q_w2v, emb_table, q_w, q_b)
    a_ref = reference_encoder(a_user, a_hist, a_avg, emb_table, a_w, a_b)

    assert q_vec.shape == (B, dim_last) and a_vec.shape == (B, dim_last)
    assert jnp.allclose(q_vec, q_ref, atol=1e-4, rtol=1e-4), "q_vec mismatch"
    assert jnp.allclose(a_vec, a_ref, atol=1e-4, rtol=1e-4), "a_vec mismatch"

    print("KERNEL_OK")
</pallas_src>

<mosaic_0001>
module attributes {stable_mosaic.version = 11 : i64} {
  func.func @encoder_kernel(%arg0: i32, %arg1: memref<16xi32, #tpu.memory_space<smem>>, %arg2: memref<8x16xf32, #tpu.memory_space<vmem>>, %arg3: memref<8x64xf32, #tpu.memory_space<vmem>>, %arg4: memref<112x128xf32, #tpu.memory_space<vmem>>, %arg5: memref<1x128xf32, #tpu.memory_space<vmem>>, %arg6: memref<64x32xf32, #tpu.memory_space<any>>, %arg7: memref<8x128xf32, #tpu.memory_space<vmem>>, %arg8: memref<8x32xf32, #tpu.memory_space<vmem>>, %arg9: memref<8x!tpu.dma_semaphore, #tpu.memory_space<semaphore_mem>>) attributes {dimension_semantics = [#tpu.dimension_semantics<parallel>], iteration_bounds = array<i64: 2>, scalar_prefetch = 1 : i64, scratch_operands = 2 : i64, tpu.core_type = #tpu.core_type<tc>, window_params = [{transform_indices = @transform_0, window_bounds = array<i64: 8, 16>}, {transform_indices = @transform_1, window_bounds = array<i64: 8, 64>}, {pipeline_mode = #tpu.pipeline_mode<synchronous>, transform_indices = @transform_2, window_bounds = array<i64: 112, 128>}, {pipeline_mode = #tpu.pipeline_mode<synchronous>, transform_indices = @transform_3, window_bounds = array<i64: 1, 128>}, {}, {transform_indices = @transform_5, window_bounds = array<i64: 8, 128>}]} {
    %c0_i32 = arith.constant 0 : i32
    %c8_i32 = arith.constant 8 : i32
    %0 = arith.addi %c0_i32, %c8_i32 : i32
    %c1_i32 = arith.constant 1 : i32
    scf.for %arg10 = %c0_i32 to %0 step %c1_i32  : i32 {
      %c1_i32_16 = arith.constant 1 : i32
      %12 = arith.muli %arg10, %c1_i32_16 : i32
      %c0_i32_17 = arith.constant 0 : i32
      %13 = arith.addi %c0_i32_17, %12 : i32
      %c8_i32_18 = arith.constant 8 : i32
      %14 = arith.muli %arg0, %c8_i32_18 : i32
      %15 = arith.addi %14, %13 : i32
      %16 = arith.index_cast %15 : i32 to index
      %17 = memref.load %arg1[%16] : memref<16xi32, #tpu.memory_space<smem>>
      %c0_i32_19 = arith.constant 0 : i32
      %18 = arith.maxsi %17, %c0_i32_19 : i32
      %c63_i32 = arith.constant 63 : i32
      %19 = arith.minsi %18, %c63_i32 : i32
      %c0_i32_20 = arith.constant 0 : i32
      %20 = tpu.memref_slice %arg6[%19, %c0_i32_20] : memref<64x32xf32, #tpu.memory_space<any>> -> memref<1x32xf32, #tpu.memory_space<any>>
      %c0_i32_21 = arith.constant 0 : i32
      %21 = tpu.memref_slice %arg8[%13, %c0_i32_21] : memref<8x32xf32, #tpu.memory_space<vmem>> -> memref<1x32xf32, #tpu.memory_space<vmem>>
      %22 = tpu.memref_slice %arg9[%13] : memref<8x!tpu.dma_semaphore, #tpu.memory_space<semaphore_mem>> -> memref<1x!tpu.dma_semaphore, #tpu.memory_space<semaphore_mem>>
      %23 = tpu.memref_squeeze %22 : memref<1x!tpu.dma_semaphore, #tpu.memory_space<semaphore_mem>> -> memref<!tpu.dma_semaphore, #tpu.memory_space<semaphore_mem>>
      tpu.enqueue_dma source(%20 : memref<1x32xf32, #tpu.memory_space<any>>) target(%21 : memref<1x32xf32, #tpu.memory_space<vmem>>) target_semaphore(%23 : memref<!tpu.dma_semaphore, #tpu.memory_space<semaphore_mem>>)
    }
    %c8_i32_0 = arith.constant 8 : i32
    %c0_i32_1 = arith.constant 0 : i32
    %c8_i32_2 = arith.constant 8 : i32
    %1 = arith.addi %c0_i32_1, %c8_i32_2 : i32
    %c1_i32_3 = arith.constant 1 : i32
    scf.for %arg10 = %c0_i32_1 to %1 step %c1_i32_3  : i32 {
      %c1_i32_16 = arith.constant 1 : i32
      %12 = arith.muli %arg10, %c1_i32_16 : i32
      %c0_i32_17 = arith.constant 0 : i32
      %13 = arith.addi %c0_i32_17, %12 : i32
      %c0_i32_18 = arith.constant 0 : i32
      %c0_i32_19 = arith.constant 0 : i32
      %14 = tpu.memref_slice %arg6[%c0_i32_18, %c0_i32_19] : memref<64x32xf32, #tpu.memory_space<any>> -> memref<1x32xf32, #tpu.memory_space<any>>
      %c0_i32_20 = arith.constant 0 : i32
      %15 = tpu.memref_slice %arg8[%13, %c0_i32_20] : memref<8x32xf32, #tpu.memory_space<vmem>> -> memref<1x32xf32, #tpu.memory_space<vmem>>
      %16 = tpu.memref_slice %arg9[%13] : memref<8x!tpu.dma_semaphore, #tpu.memory_space<semaphore_mem>> -> memref<1x!tpu.dma_semaphore, #tpu.memory_space<semaphore_mem>>
      %17 = tpu.memref_squeeze %16 : memref<1x!tpu.dma_semaphore, #tpu.memory_space<semaphore_mem>> -> memref<!tpu.dma_semaphore, #tpu.memory_space<semaphore_mem>>
      tpu.wait_dma2 semaphore(%17 : memref<!tpu.dma_semaphore, #tpu.memory_space<semaphore_mem>>) src(%14 : memref<1x32xf32, #tpu.memory_space<any>>) dst(%15 : memref<1x32xf32, #tpu.memory_space<vmem>>)
    }
    %c8_i32_4 = arith.constant 8 : i32
    %c0 = arith.constant 0 : index
    %c0_5 = arith.constant 0 : index
    %2 = vector.load %arg8[%c0, %c0_5] : memref<8x32xf32, #tpu.memory_space<vmem>>, vector<8x32xf32>
    %c0_6 = arith.constant 0 : index
    %c0_7 = arith.constant 0 : index
    %3 = vector.load %arg2[%c0_6, %c0_7] : memref<8x16xf32, #tpu.memory_space<vmem>>, vector<8x16xf32>
    %c0_8 = arith.constant 0 : index
    %c0_9 = arith.constant 0 : index
    %4 = vector.load %arg3[%c0_8, %c0_9] : memref<8x64xf32, #tpu.memory_space<vmem>>, vector<8x64xf32>
    %5 = tpu.concatenate %2, %3, %4 in 1 : vector<8x32xf32>, vector<8x16xf32>, vector<8x64xf32> -> vector<8x112xf32>
    %c0_10 = arith.constant 0 : index
    %c0_11 = arith.constant 0 : index
    %6 = vector.load %arg4[%c0_10, %c0_11] : memref<112x128xf32, #tpu.memory_space<vmem>>, vector<112x128xf32>
    %cst = arith.constant dense<0.000000e+00> : vector<8x128xf32>
    %7 = tpu.matmul %5, %6, %cst {dimension_numbers = #tpu.dot_dimension_numbers<[1], [0], [0], [1], [0, 0, 1, 1], [], []>} : vector<8x112xf32>, vector<112x128xf32>, vector<8x128xf32> -> vector<8x128xf32>
    %c0_12 = arith.constant 0 : index
    %c0_13 = arith.constant 0 : index
    %8 = vector.load %arg5[%c0_12, %c0_13] : memref<1x128xf32, #tpu.memory_space<vmem>>, vector<1x128xf32>
    %9 = vector.broadcast %8 : vector<1x128xf32> to vector<8x128xf32>
    %10 = arith.addf %7, %9 : vector<8x128xf32>
    %c0_14 = arith.constant 0 : index
    %c0_15 = arith.constant 0 : index
    %11 = vector.load %arg7[%c0_14, %c0_15] : memref<8x128xf32, #tpu.memory_space<vmem>>, vector<8x128xf32>
    tpu.vector_store %arg7[%c0_14, %c0_15], %10 {strides = array<i32>} : memref<8x128xf32, #tpu.memory_space<vmem>>, vector<8x128xf32>,
    return
  }
  func.func @transform_0(%arg0: i32, %arg1: memref<16xi32, #tpu.memory_space<smem>>) -> (i32, i32) {
    %c0_i32 = arith.constant 0 : i32
    %c0_i32_0 = arith.constant 0 : i32
    return %arg0, %c0_i32 : i32, i32
  }
  func.func @transform_1(%arg0: i32, %arg1: memref<16xi32, #tpu.memory_space<smem>>) -> (i32, i32) {
    %c0_i32 = arith.constant 0 : i32
    %c0_i32_0 = arith.constant 0 : i32
    return %arg0, %c0_i32 : i32, i32
  }
  func.func @transform_2(%arg0: i32, %arg1: memref<16xi32, #tpu.memory_space<smem>>) -> (i32, i32) {
    %c0_i32 = arith.constant 0 : i32
    %c0_i32_0 = arith.constant 0 : i32
    %c0_i32_1 = arith.constant 0 : i32
    return %c0_i32, %c0_i32_0 : i32, i32
  }
  func.func @transform_3(%arg0: i32, %arg1: memref<16xi32, #tpu.memory_space<smem>>) -> (i32, i32) {
    %c0_i32 = arith.constant 0 : i32
    %c0_i32_0 = arith.constant 0 : i32
    %c0_i32_1 = arith.constant 0 : i32
    return %c0_i32, %c0_i32_0 : i32, i32
  }
  func.func @transform_5(%arg0: i32, %arg1: memref<16xi32, #tpu.memory_space<smem>>) -> (i32, i32) {
    %c0_i32 = arith.constant 0 : i32
    %c0_i32_0 = arith.constant 0 : i32
    return %arg0, %c0_i32 : i32, i32
  }
}

</mosaic_0001>

<bundles_post_ra>
// kernel: tpu_custom_call.1
= control target key start
LH: loop header
LB: loop body
LE: loop exit
PB: predicated region body
PF: predicated region fallthrough
CT: control target
= control target key end

     0   :  { %s1100_s0 = inlined_call_operand.vmem [shape: s32[16], index: 0, kind: input, shape index: {}]   ;;  %s1101_s1 = inlined_call_operand.vmem [shape: f32[16,16], index: 1, kind: input, shape index: {}]   ;;  %s1102_s2 = inlined_call_operand.vmem [shape: f32[16,64], index: 2, kind: input, shape index: {}]   ;;  %s1103_s3 = inlined_call_operand.hbm [shape: f32[112,128], index: 3, kind: input, shape index: {}]   ;;  %s1104_s4 = inlined_call_operand.vmem [shape: f32[1,128], index: 4, kind: input, shape index: {}]   ;;  %s1105_s5 = inlined_call_operand.vmem [shape: f32[64,32], index: 5, kind: input, shape index: {}]   ;;  %s1106_s6 = inlined_call_operand.hbm [shape: f32[16,128], index: 6, kind: output, shape index: {}]  }
   0x1   :  { %s11_s23 = sshll.u32 %s1100_s0, 4  ;;  %s12_s23 = int_to_ptr.vmem [resolvable:$true] %s11_s23 }
   0x2   :  { %s762_s24 = scalar_lea.vmem %s12_s23, 16  ;;  %p767_p1 = scmp.lt.s32.totalorder %s12_s23, %s12_s23 }
   0x3   :  { %p763_p0 = scmp.ne.s32.totalorder %s12_s23, %s762_s24  ;;  %p768_p2 = scmp.lt.s32.totalorder %s762_s24, %s762_s24 }
   0x5   :  { %p769_p3 = por %p768_p2, %p767_p1 }
   0x7   :  { %p770_p4 = pnand %p769_p3, %p763_p0 }
   0x9   :  { %773 = shalt.err (!%p770_p4)  }
   0xa   :  { %s890_s25 = smov [#allocation5]  }
   0xb   :  { %14 = dma.vmem_to_smem %s12_s23, 16, %s890_s25, [#allocation4] }
   0xc   :  { %854 = dma.done.wait [#allocation4], 16 }
   0xd   :  { %855 = vsyncadd [#allocation4], 4294967280 }
   0xe   :  { %16 = sfence }
   0xf   :  { %17 = vsyncpa [#allocation7], 0 }
  0x10   :  { %18 = vsyncpa [#allocation8], 0 }
  0x11   :  { %20 = vsyncpa [#allocation8 + $0x1], 0  ;;  %s938_s26 = smov 0   ;;  %s940_s27 = smov 0  }
  0x12   :  { %s942_s0 = smov 0   ;;  %s944_s28 = smov 0  }
  0x13 LB: > { %s959_s29 = sadd.s32 4294967295, %s880_s28   ;;  %s590_s30 = sadd.s32 4294967294, %s880_s28   ;;  %s880_s28 = sphi %s944_s28, %s1122_s28   ;;  %s876_s0 = sphi %s942_s0, %s1121_s0   ;;  %s872_s27 = sphi %s940_s27, %s1120_s27   ;;  %s868_s26 = sphi %s938_s26, %s1119_s26  }
  0x14   : > { %s963_s7 = sadd.s32 1, %s880_s28   ;;  %s127_s8 = sadd.s32 1, %s876_s0 }
  0x15   : > { %s124_s9 = ssub.s32 %s880_s28, %s963_s7  ;;  %p137_p5 = scmp.ne.s32.totalorder %s876_s0, %s872_s27 }
  0x16   : > { %p125_p6 = scmp.eq.s32.totalorder %s124_s9, 0  ;;  %p138_p7 = scmp.eq.s32.totalorder %s959_s29, 1 }
  0x17   : > { %p143_p8 = scmp.ne.s32.totalorder %s872_s27, %s868_s26  ;;  %p144_p9 = scmp.eq.s32.totalorder %s590_s30, 1 }
  0x18   : > { %s974_s10 = scalar_select %p125_p6, %s876_s0, %s127_s8  }
  0x19   : > { %p976_p10 = por %p138_p7, %p137_p5  ;;  %p980_p11 = por %p144_p9, %p143_p8 }
  0x1a   : > { %p591_p12 = scmp.ge.s32.totalorder %s880_s28, 1  ;;  %p151_p13 = scmp.lt.s32.totalorder %s880_s28, 3 }
  0x1b   : > { %s1110_s11 = scalar_select %p976_p10, 1, 0 }
  0x1c   : > { %s1111_s12 = scalar_select %p980_p11, 1, 0 }
  0x1d   : > { %p1107_p0 = scmp.eq.s32.totalorder %s959_s29, 0  ;;  %p987_p1 = pnand %p591_p12, %p151_p13 }
  0x1e   : > { %s891_s14 = smov [#allocation6]   ;;  %s774_s19 = scalar_lea.hbm %s1103_s3, 1792 }
  0x1f   : > { %s1112_s13 = scalar_select %p987_p1, 1, 0 }
  0x20   : > { %s163_s15 = sshll.u32 %s891_s14, 4  ;;  %p694_p2 = pneg %p987_p1  ;;  %s164_s15 = int_to_ptr.vmem [resolvable:$true] %s163_s15 }
  0x21   : > { %p775_p4 = scmp.ne.s32.totalorder %s1103_s3, %s774_s19  ;;  %p781_p8 = scmp.lt.u32.totalorder %s774_s19, %s1103_s3 }
  0x22   : > { %p995_p3 = pnand %p1107_p0, %p694_p2 }
  0x24   : > { %p776_p5 = pneg %p995_p3 }
  0x26   : > { %p777_p6 = pnand %p776_p5, %p775_p4 }
  0x28   : > { %p778_p7 = pneg %p777_p6 }
  0x2a   : > { %p783_p9 = pnand %p781_p8, %p778_p7 }
  0x2c   : > { %786 = shalt.err (!%p783_p9)
}
  0x2d   : > { %s787_s24 = scalar_lea.vmem %s164_s15, 1792  ;;  %p795_p0 = scmp.lt.s32.totalorder %s164_s15, %s164_s15 }
  0x2e   : > { %p788_p12 = scmp.ne.s32.totalorder %s164_s15, %s787_s24  ;;  %p796_p11 = scmp.lt.s32.totalorder %s787_s24, %s787_s24 }
  0x30   : > { %p790_p13 = pnand %p788_p12, %p776_p5  ;;  %p797_p10 = por %p796_p11, %p795_p0 }
  0x32   : > { %p791_p2 = pneg %p790_p13 }
  0x34   : > { %p798_p1 = pnand %p797_p10, %p791_p2 }
  0x36   : > { %801 = shalt.err (!%p798_p1)
}
  0x37   : > { %s892_s25 = smov 128   ;;  %s893_s30 = smov 8  }
  0x38   : > { %697 = dma.hbm_to_vmem [thread:$0]  (!%p995_p3), %s1103_s3, 1792, %s164_s15, [#allocation7], %s892_s25, %s892_s25, %s893_s30  }
  0x39   : > { %p1114_p4 = scmp.ne.s32.totalorder %s1112_s13, 0 }
  0x3a   : > { %p1115_p6 = scmp.eq.s32.totalorder (!%p1114_p4), %s959_s29, 0 }
  0x3b   : > { %196 = sbr.rel (%p1114_p4) target bundleno = 451 (0x1c3), region = 36 }
  0x42   : > { %857 = dma.done.wait (%p1115_p6), [#allocation7], 1792   ;;  %p1116_p5 = pmov %p1115_p6 }
  0x43   : > { %s222_s14 = sand.u32 1, %s872_s27   ;;  %p225_p10 = scmp.lt.s32.totalorder %s959_s29, 1 }
  0x44   : > { %859 = vsyncadd (%p1116_p5), [#allocation7], 4294965504  ;;  %s1025_s16 = sshll.u32 %s222_s14, 3  ;;  %s882_s24 = smov 0  }
  0x45   : > { %s226_s15 = scalar_select %p225_p10, %s959_s29, 1 }
  0x46   : > { %s224_s23 = scalar_lea.vmem [#allocation9], %s1025_s16 }
  0x47   : > { %s597_s17 = sshll.u32 %s226_s15, 3 }
  0x48   : > { %s1031_s19 = scalar_lea.vmem %s1101_s1, %s597_s17  ;;  %s1036_s22 = scalar_lea.vmem %s1102_s2, %s597_s17 }
  0x49 LB: >> { %s599_s25 = sshll.u32 %s959_s29, 3  ;;  %s247_s17 = scalar_lea.vmem [#allocation2], %s884_s24  ;;  %s884_s24 = sphi %s882_s24, %s238_s24  }
  0x4a   : >> { %s240_s30 = sadd.s32 %s884_s24, %s599_s25  ;;  %s248_s18 = scalar_lea.sflag [#allocation3], %s884_s24 }
  0x4b   : >> { %s241_s8 = sld [smem:[#allocation5 + %s240_s30]] }
  0x51   : >> { %p242_p11 = scmp.gt.s32.totalorder %s241_s8, 0  ;;  %p600_p0 = scmp.lt.s32.totalorder %s241_s8, 63 }
  0x53   : >> { %s1124_s8 = smov (!%p242_p11, %s241_s8), 0 }
  0x54   : >> { %s1126_s8 = smov (!%p600_p0, %s1124_s8), 63 }
  0x55   : >> { %s246_s13 = scalar_lea.vmem %s1105_s5, %s1126_s8 }
  0x56   : >> { %v266_v0 = vld [vmem:[%s246_s13] sm:$0x1] }
  0x57   : >> { %267 = vst [vmem:[%s247_s17] sm:$0x1] %v266_v0 }
  0x58   : >> { %292 = vsyncadd %s248_s18, 16  ;;  %s238_s24 = sadd.s32 1, %s884_s24  }
  0x59   : >> { %p235_p1 = scmp.ge.s32.totalorder %s238_s24, 8  }
  0x5a   : > { %s886_s20 = smov (%p235_p1), 0  }
  0x5b   : > { %237 = sbr.rel (!%p235_p1) target bundleno = 73 (0x49), region = 144 }
  0x62 LB: >> { %s299_s21 = scalar_lea.sflag [#allocation3], %s888_s20  ;;  %s888_s20 = sphi %s886_s20, %s298_s20  }
  0x63   : >> { %860 = dma.done.wait %s299_s21, 16 }
  0x64   : >> { %861 = vsyncadd %s299_s21, 4294967280  ;;  %s298_s20 = sadd.s32 1, %s888_s20  }
  0x65   : >> { %p295_p3 = scmp.ge.s32.totalorder %s298_s20, 8  }
  0x66   : > { %v304_v1 = vld [vmem:[%s1031_s19] sm:$0xff] (%p295_p3)  ;;  %v318_v2 = vld [vmem:[#allocation6] sm:$0xff] (%p295_p3)  ;;  %s894_s25 = smov (%p295_p3), 32   ;;  %v895_v3 = vmov (%p295_p3), 0.0|0.0   ;;  %v319_v4 = vld [vmem:[#allocation6 + $0x8] sm:$0xff] (%p295_p3)  ;;  %vm896_vm0 = vmmov (%p295_p3), 0  }
  0x67   : > { %297 = sbr.rel (!%p295_p3) target bundleno = 98 (0x62), region = 155  ;;  %307 = vrot.lane.b32.xlu0 (%p295_p3), %v304_v1, %s894_s25  ;;  %667 = vmatprep.subr.bf16.mxu0 (%p295_p3), %v895_v3  ;;  %v320_v5 = vld [vmem:[#allocation6 + $0x10] sm:$0xff] (%p295_p3)  ;;  %v321_v6 = vld [vmem:[#allocation6 + $0x18] sm:$0xff] (%p295_p3)  ;;  %v668_v8 = vpack.c.bf16 (%p295_p3), %v319_v4, %v318_v2  ;;  %v897_v9 = vmov (%p295_p3), 0.0   ;;  %s898_s24 = smov (%p295_p3), 48   ;;  %v322_v11 = vld [vmem:[#allocation6 + $0x20] sm:$0xff] (%p295_p3) }
  0x68   : > { %v305_v7 = vld [vmem:[%s1036_s22] sm:$0xff] (%p295_p3)  ;;  %664 = vmatprep.mubr.msk.f32.mxu0 (%p295_p3), %vm896_vm0, %v897_v9  ;;  %v671_v10 = vpack.c.bf16 (%p295_p3), %v321_v6, %v320_v5  ;;  %v323_v12 = vld [vmem:[#allocation6 + $0x28] sm:$0xff] (%p295_p3)  ;;  %v324_v14 = vld [vmem:[#allocation6 + $0x30] sm:$0xff] (%p295_p3)  ;;  %vm314_vm1 = vcmask (%p295_p3), 261120   ;;  %vm316_vm2 = vcmask (%p295_p3), 392192   ;;  %vm339_vm3 = vcmask (%p295_p3), 916480  }
  0x69   : > { %669 = vmatpush3.bf16.msra.mxu0 (%p295_p3), %v668_v8  ;;  %v674_v13 = vpack.c.bf16 (%p295_p3), %v323_v12, %v322_v11  ;;  %v325_v15 = vld [vmem:[#allocation6 + $0x38] sm:$0xff] (%p295_p3)  ;;  %v326_v17 = vld [vmem:[#allocation6 + $0x40] sm:$0xff] (%p295_p3)  ;;  %v327_v18 = vld [vmem:[#allocation6 + $0x48] sm:$0xff] (%p295_p3)  ;;  %s608_s30 = sshll.u32 (%p295_p3), %s959_s29, 7  ;;  %s428_s8 = sshll.u32 (%p295_p3), %s224_s23, 4  ;;  %s1056_s8 = int_to_ptr.vmem [resolvable:$true] %s428_s8 }
  0x6a   : > { %670 = vmatprep.subr.bf16.mxu0 (%p295_p3), %v895_v3  ;;  %v677_v16 = vpack.c.bf16 (%p295_p3), %v325_v15, %v324_v14  ;;  %v680_v19 = vpack.c.bf16 (%p295_p3), %v327_v18, %v326_v17  ;;  %v328_v20 = vld [vmem:[#allocation6 + $0x50] sm:$0xff] (%p295_p3)  ;;  %v329_v21 = vld [vmem:[#allocation6 + $0x58] sm:$0xff] (%p295_p3)  ;;  %v330_v23 = vld [vmem:[#allocation6 + $0x60] sm:$0xff] (%p295_p3)  ;;  %s1054_s13 = scalar_lea.hbm (%p295_p3), %s1106_s6, %s608_s30  ;;  %s415_s17 = scalar_lea.sflag (%p295_p3), [#allocation8], %s222_s14 }
  0x6b   : > { %311 = vrot.lane.b32.xlu0 (%p295_p3), %v305_v7, %s898_s24  ;;  %v683_v22 = vpack.c.bf16 (%p295_p3), %v329_v21, %v328_v20  ;;  %v331_v24 = vld [vmem:[#allocation6 + $0x68] sm:$0xff] (%p295_p3)  ;;  %v303_v27 = vld [vmem:[#allocation2] sm:$0xff] (%p295_p3)  ;;  %s802_s29 = scalar_lea.vmem (%p295_p3), %s1056_s8, 128  ;;  %p1117_p8 = scmp.ne.s32.totalorder (%p295_p3), %s1110_s11, 0 }
  0x6c   : > { %v686_v25 = vpack.c.bf16 (%p295_p3), %v331_v24, %v330_v23  ;;  %v605_v31 = vld [vmem:[%s1104_s4] ss:$0 sm:$0xff] (%p295_p3)  ;;  %p803_p7 = scmp.ne.s32.totalorder (%p295_p3), %s1056_s8, %s802_s29  ;;  %s899_s18 = smov (%p295_p3), [#allocation9]  }
  0x6d   : > { %672 = vmatpush3.bf16.msra.mxu0 (%p295_p3), %v671_v10  ;;  %s806_s20 = sshll.u32 (%p295_p3), %s899_s18, 4  ;;  %s807_s20 = int_to_ptr.vmem [resolvable:$false] %s806_s20 }
  0x6e   : > { %673 = vmatprep.subr.bf16.mxu0 %v895_v3  ;;  %p804_p9 = pnand %p803_p7, %p1117_p8  ;;  %s808_s21 = scalar_lea.vmem %s807_s20, 256 }
  0x6f   : > { %p809_p13 = scmp.lt.s32.totalorder %s1056_s8, %s807_s20  ;;  %p810_p2 = scmp.lt.s32.totalorder %s808_s21, %s802_s29 }
  0x70   : > { %p805_p12 = pneg %p804_p9 }
  0x71   : > { %675 = vmatpush3.bf16.msra.mxu0 %v674_v13  ;;  %p811_p4 = por %p810_p2, %p809_p13 }
  0x72   : > { %676 = vmatprep.subr.bf16.mxu0 %v895_v3 }
  0x73   : > { %p812_p6 = pnand %p811_p4, %p805_p12 }
  0x75   : > { %678 = vmatpush3.bf16.msra.mxu0 %v677_v16 }
  0x76   : > { %679 = vmatprep.subr.bf16.mxu0 %v895_v3 }
  0x79   : > { %681 = vmatpush3.bf16.msra.mxu0 %v680_v19 }
  0x7a   : > { %682 = vmatprep.subr.bf16.mxu0 %v895_v3 }
  0x7d   : > { %684 = vmatpush3.bf16.msra.mxu0 %v683_v22 }
  0x7e   : > { %685 = vmatprep.subr.bf16.mxu0 %v895_v3 }
  0x81   : > { %687 = vmatpush3.bf16.msra.mxu0 %v686_v25 }
  0xd9   : > { %v308_v26 = vpop.permute.xlu0 %307 }
  0xda   : > { %v315_v28 = vsel %vm314_vm1, %v303_v27, %v308_v26 }
  0xdd   : > { %v312_v29 = vpop.permute.xlu0 %311 }
  0xde   : > { %v317_v30 = vsel %vm316_vm2, %v315_v28, %v312_v29 }
  0xdf   : > { %665 = vmatmul.mubr.msk.f32.vlgmr.msra.gmra.mrb[0].mxu0 %vm339_vm3, %v317_v30 }
 0x1b2   : > { %v409_v32 = vpop.f32.mrb[0].mxu0 }
 0x1b3   : > { %v410_v33 = vadd.f32 %v605_v31, %v409_v32  ;;  %v666_v34 = vpop.f32.mrb[1].mxu0 }
 0x1b5   : > { %413 = vst [vmem:[%s224_s23] sm:$0xff] %v410_v33 }
 0x1b6   : > { %815 = shalt.err (!%p812_p6)
}
 0x1b7   : > { %s816_s14 = scalar_lea.hbm %s1054_s13, 128  ;;  %s820_s25 = scalar_lea.hbm %s1106_s6, 256 }
 0x1b8   : > { %p817_p5 = scmp.ne.s32.totalorder %s1054_s13, %s816_s14  ;;  %p821_p0 = scmp.lt.u32.totalorder %s1054_s13, %s1106_s6 }
 0x1b9   : > { %p822_p1 = scmp.lt.u32.totalorder %s820_s25, %s816_s14  ;;  %p824_p7 = scmp.lt.u32.totalorder %s816_s14, %s1054_s13 }
 0x1ba   : > { %p818_p10 = pnand %p817_p5, %p1117_p8 }
 0x1bb   : > { %p823_p3 = por %p822_p1, %p821_p0 }
 0x1bc   : > { %p819_p11 = pneg %p818_p10 }
 0x1bd   : > { %p825_p9 = por %p824_p7, %p823_p3 }
 0x1bf   : > { %p826_p12 = pnand %p825_p9, %p819_p11 }
 0x1c1   : > { %829 = shalt.err (!%p826_p12)
}
 0x1c2   : > { %692 = dma.vmem_to_hbm [thread:$0]  (%p1117_p8), %s1056_s8, 128, %s1054_s13, %s415_s17  }
 0x1c3 PF: > { %p704_p13 = scmp.ge.s32.totalorder %s880_s28, 2  ;;  %s440_s22 = sand.u32 1, %s868_s26  }
 0x1c4   : > { %p1118_p2 = scmp.ne.s32.totalorder %s1111_s12, 0  ;;  %s441_s30 = scalar_lea.sflag [#allocation8], %s440_s22 }
 0x1c6   : > { %p699_p4 = pnand %p704_p13, %p1118_p2 }
 0x1c8   : > { %863 = dma.done.wait (!%p699_p4), %s441_s30, 128  }
 0x1c9   : > { %865 = vsyncadd (!%p699_p4), %s441_s30, 4294967168  ;;  %p23_p6 = scmp.ge.s32.totalorder %s963_s7, 4   ;;  %s1119_s26 = smov %s872_s27 }
 0x1ca   : > { %s1120_s27 = smov %s876_s0  ;;  %s1121_s0 = smov %s974_s10 }
 0x1cb   : > { %s1122_s28 = smov %s963_s7  ;;  %25 = sbr.rel (!%p23_p6) target bundleno = 19 (0x13), region = 166 }
 0x1d2   :  { %446 = vsyncpa [#allocation7], 1 }
 0x1d3   :  { %448 = vsyncpa [#allocation7 + $0x1], 1 }
 0x1d4   :  { %449 = vsyncpa [#allocation8], 1 }
 0x1d5   :  { %451 = vsyncpa [#allocation8 + $0x1], 1 }
 0x1d6   :  { %452 = vsyncmov [#allocation3] }
 0x1d9   :  { %s453_s28 = vpop.sfrf %452 }
 0x1da   :  { %p611_p8 = scmp.ne.s32.totalorder %s453_s28, 0 }
 0x1dc   :  { %457 = shalt.err (%p611_p8)  }
 0x1dd   :  { %459 = vsyncmov [#allocation3 + $0x1] }
 0x1e0   :  { %s460_s11 = vpop.sfrf %459 }
 0x1e1   :  { %p612_p5 = scmp.ne.s32.totalorder %s460_s11, 0 }
 0x1e3   :  { %464 = shalt.err (%p612_p5)  }
 0x1e4   :  { %466 = vsyncmov [#allocation3 + $0x2] }
 0x1e7   :  { %s467_s12 = vpop.sfrf %466 }
 0x1e8   :  { %p613_p10 = scmp.ne.s32.totalorder %s467_s12, 0 }
 0x1ea   :  { %471 = shalt.err (%p613_p10)  }
 0x1eb   :  { %473 = vsyncmov [#allocation3 + $0x3] }
 0x1ee   :  { %s474_s10 = vpop.sfrf %473 }
 0x1ef   :  { %p614_p11 = scmp.ne.s32.totalorder %s474_s10, 0 }
 0x1f1   :  { %478 = shalt.err (%p614_p11)  }
 0x1f2   :  { %480 = vsyncmov [#allocation3 + $0x4] }
 0x1f5   :  { %s481_s1 = vpop.sfrf %480 }
 0x1f6   :  { %p615_p0 = scmp.ne.s32.totalorder %s481_s1, 0 }
 0x1f8   :  { %485 = shalt.err (%p615_p0)  }
 0x1f9   :  { %487 = vsyncmov [#allocation3 + $0x5] }
 0x1fc   :  { %s488_s2 = vpop.sfrf %487 }
 0x1fd   :  { %p616_p1 = scmp.ne.s32.totalorder %s488_s2, 0 }
 0x1ff   :  { %492 = shalt.err (%p616_p1)  }
 0x200   :  { %494 = vsyncmov [#allocation3 + $0x6] }
 0x203   :  { %s495_s3 = vpop.sfrf %494 }
 0x204   :  { %p617_p3 = scmp.ne.s32.totalorder %s495_s3, 0 }
 0x206   :  { %499 = shalt.err (%p617_p3)  }
 0x207   :  { %501 = vsyncmov [#allocation3 + $0x7] }
 0x20a   :  { %s502_s4 = vpop.sfrf %501 }
 0x20b   :  { %p618_p7 = scmp.ne.s32.totalorder %s502_s4, 0 }
 0x20d   :  { %506 = shalt.err (%p618_p7)  }

</bundles_post_ra>
